<compile_context>
chip_gen: v7x
topology: tpu7x:2x2x1
jax: 0.10.0
libtpu: 0.0.40
codegen_flags: <defaults>
</compile_context>

<pallas_src>
import jax
import jax.numpy as jnp
from jax.experimental import pallas as pl
from jax.experimental.pallas import tpu as pltpu

HIDDEN_SIZE = 256
LANES = 128          # TPU lane width: pad the narrow act_dim output up to this
NEG_BIG = -1.0e30    # padded logits -> exp underflows to exactly 0 in the softmax


def _round_up(x, m):
    return -(-x // m) * m


# ----------------------------------------------------------------------------- kernel
def actor_kernel(x_ref, w1_ref, b1_ref, w2_ref, b2_ref, w3_ref, b3_ref, out_ref):
    # prev_dense: Linear(obs_dim, 256) + Identity
    h1 = jnp.dot(x_ref[...], w1_ref[...], preferred_element_type=jnp.float32)
    h1 = h1 + b1_ref[...]                      # b1 is (1, 256), broadcasts over rows

    # post_dense layer 1: Linear(256, 256) + ReLU
    h2 = jnp.dot(h1.astype(w2_ref.dtype), w2_ref[...],
                 preferred_element_type=jnp.float32)
    h2 = jnp.maximum(h2 + b2_ref[...], 0.0)

    # post_dense layer 2: Linear(256, act_pad) + Softmax(dim=-1)
    # w3 columns beyond act_dim are zero and b3 entries are NEG_BIG, so padded lanes
    # contribute exp(NEG_BIG - m) == 0 to the denominator.
    logits = jnp.dot(h2.astype(w3_ref.dtype), w3_ref[...],
                     preferred_element_type=jnp.float32)
    logits = logits + b3_ref[...]
    m = jnp.max(logits, axis=-1, keepdims=True)
    e = jnp.exp(logits - m)
    denom = jnp.sum(e, axis=-1, keepdims=True)           # >= 1, so rcp is well-conditioned
    r = pl.reciprocal(denom, approx=True)                 # EUP slot (otherwise idle here)
    r = r * (2.0 - denom * r)                             # one Newton step -> ~1e-7 rel err
    out_ref[...] = (e * r).astype(out_ref.dtype)


# ----------------------------------------------------------------------------- params
def init_actor_params(key, obs_dim, act_dim):
    """Deterministic init mimicking PyTorch's default uniform(-1/sqrt(fan_in), 1/sqrt(fan_in))."""
    ks = jax.random.split(key, 6)

    def lin(kw, kb, fan_in, fan_out):
        bound = 1.0 / jnp.sqrt(jnp.float32(fan_in))
        w = jax.random.uniform(kw, (fan_in, fan_out), jnp.float32, -bound, bound)
        b = jax.random.uniform(kb, (1, fan_out), jnp.float32, -bound, bound)
        return w, b

    w1, b1 = lin(ks[0], ks[1], obs_dim, HIDDEN_SIZE)
    w2, b2 = lin(ks[2], ks[3], HIDDEN_SIZE, HIDDEN_SIZE)
    w3, b3 = lin(ks[4], ks[5], HIDDEN_SIZE, act_dim)
    return {"w1": w1, "b1": b1, "w2": w2, "b2": b2, "w3": w3, "b3": b3}


def prepare_actor_params(params, *, use_bf16_matmul=False):
    """One-time preparation: pad act_dim -> 128 lanes, optionally cast matmul weights to bf16.

    Doing this once (instead of per forward call) removes a fixed per-call HBM pass and
    extra XLA ops from the dispatch path. Biases stay f32 (bias/ReLU/softmax run in f32).
    """
    w1, b1, w2, b2, w3, b3 = (params["w1"], params["b1"], params["w2"],
                              params["b2"], params["w3"], params["b3"])
    act_dim = w3.shape[1]
    act_pad = _round_up(act_dim, LANES)
    if act_pad != act_dim:
        w3 = jnp.pad(w3, ((0, 0), (0, act_pad - act_dim)))
        b3 = jnp.pad(b3, ((0, 0), (0, act_pad - act_dim)), constant_values=NEG_BIG)

    wdt = jnp.bfloat16 if use_bf16_matmul else jnp.float32
    prepped = {
        "w1": w1.astype(wdt), "b1": b1.astype(jnp.float32),
        "w2": w2.astype(wdt), "b2": b2.astype(jnp.float32),
        "w3": w3.astype(wdt), "b3": b3.astype(jnp.float32),
        "act_dim": act_dim,
    }
    return prepped


# ----------------------------------------------------------------------------- tiling
def _pick_tile(B, big_tile):
    """Pick the batch tile: big enough to amortize grid-step overhead, but keep >=2 tiles
    when B allows it so v7x's two TensorCores both get work (no effect on v5e/v6e)."""
    if B > big_tile:
        return big_tile
    half = max(8, _round_up(-(-B // 2), 8))
    tile = min(big_tile, half)
    if tile >= B:                        # tiny batch: single minimal 8-row-aligned tile
        tile = max(8, _round_up(B, 8))
    return tile


# ----------------------------------------------------------------------------- wrapper
def actor_forward(x, prepped, *, big_tile=2048, return_padded=False):
    """x: [B, obs_dim] float32. prepped: output of prepare_actor_params.

    Returns [B, act_dim] f32, or the lane-dense padded [b_pad, 128k] block if
    return_padded=True (avoids the extra HBM slice pass for very large B; padded
    lanes are exactly 0 and padded rows are garbage-but-unreferenced).
    """
    w1, b1, w2, b2, w3, b3 = (prepped["w1"], prepped["b1"], prepped["w2"],
                              prepped["b2"], prepped["w3"], prepped["b3"])
    act_dim = prepped["act_dim"]
    B, obs_dim = x.shape
    act_pad = w3.shape[1]

    if w1.dtype == jnp.bfloat16:
        x = x.astype(jnp.bfloat16)       # activations match weight dtype for the MXU

    tile_m = _pick_tile(B, big_tile)
    b_pad = _round_up(B, tile_m)
    if b_pad != B:
        x = jnp.pad(x, ((0, b_pad - B), (0, 0)))

    # --- estimated VMEM footprint (double-buffered x/out tiles + resident weights) ---
    itemsize_x = jnp.dtype(x.dtype).itemsize
    weight_bytes = sum(int(a.size) * jnp.dtype(a.dtype).itemsize
                       for a in (w1, b1, w2, b2, w3, b3))
    est_vmem = (2 * tile_m * obs_dim * itemsize_x      # double-buffered input tile
                + 2 * tile_m * act_pad * 4             # double-buffered f32 output tile
                + weight_bytes)
    cp_kwargs = dict(dimension_semantics=("parallel",))   # shard batch tiles across TCs
    # TODO(synk): on v7x, verify in the trace that the batch axis splits across both
    # TensorCores; if not, switch this axis to pltpu.CORE_PARALLEL.
    if est_vmem > 12 * 1024 * 1024:      # smallest scoped default (v5e) is 16 MiB
        cp_kwargs["vmem_limit_bytes"] = min(int(est_vmem * 2), 56 * 1024 * 1024)

    grid = (b_pad // tile_m,)
    const = lambda shape: pl.BlockSpec(shape, lambda i: (0, 0))  # VMEM-resident across tiles

    out_padded = pl.pallas_call(
        actor_kernel,
        out_shape=jax.ShapeDtypeStruct((b_pad, act_pad), jnp.float32),
        grid=grid,
        in_specs=[
            pl.BlockSpec((tile_m, obs_dim), lambda i: (i, 0)),   # activations: tiled over batch
            const(w1.shape), const(b1.shape),                    # weights/biases: constant index
            const(w2.shape), const(b2.shape),
            const(w3.shape), const(b3.shape),
        ],
        out_specs=pl.BlockSpec((tile_m, act_pad), lambda i: (i, 0)),  # lane-dense [tile_m, 128k]
        compiler_params=pltpu.CompilerParams(**cp_kwargs),
    )(x, w1, b1, w2, b2, w3, b3)

    if return_padded:
        return out_padded
    return out_padded[:B, :act_dim]


# ----------------------------------------------------------------------------- reference
def actor_reference(x, p):
    h1 = x @ p["w1"] + p["b1"]
    h2 = jax.nn.relu(h1 @ p["w2"] + p["b2"])
    return jax.nn.softmax(h2 @ p["w3"] + p["b3"], axis=-1)


if __name__ == "__main__":
    key = jax.random.PRNGKey(0)
    k_x, k_p, k_big = jax.random.split(key, 3)

    B, OBS_DIM, ACT_DIM, NUM_AGENTS = 2, 32, 8, 3  # num_agents unused in forward

    obs_batch = jax.random.normal(k_x, (B, OBS_DIM), jnp.float32)
    params = init_actor_params(k_p, OBS_DIM, ACT_DIM)

    prepped_f32 = prepare_actor_params(params)                         # once, not per call
    prepped_bf16 = prepare_actor_params(params, use_bf16_matmul=True)  # once, not per call

    # Small-batch path (single 8-row tile, lane-padded output), exact f32 compute.
    out = actor_forward(obs_batch, prepped_f32)
    out = jax.block_until_ready(out)
    ref = actor_reference(obs_batch, params)
    assert out.shape == (B, ACT_DIM)
    assert jnp.allclose(out, ref, atol=1e-5, rtol=1e-5), "mismatch vs pure-JAX reference"
    assert jnp.allclose(jnp.sum(out, axis=-1), 1.0, atol=1e-5), "softmax rows must sum to 1"

    # Large-batch path: exercises the multi-tile grid (tile picker keeps >=2 tiles).
    big_x = jax.random.normal(k_big, (512, OBS_DIM), jnp.float32)
    big_out = jax.block_until_ready(actor_forward(big_x, prepped_f32))
    big_ref = actor_reference(big_x, params)
    assert big_out.shape == (512, ACT_DIM)
    assert jnp.allclose(big_out, big_ref, atol=1e-5, rtol=1e-5), "large-batch mismatch"

    # bf16 MXU path (f32 accumulation/softmax): looser tolerance vs. the f32 reference.
    bf_out = jax.block_until_ready(actor_forward(big_x, prepped_bf16))
    assert bf_out.shape == (512, ACT_DIM)
    assert jnp.allclose(bf_out, big_ref, atol=2e-2, rtol=2e-2), "bf16-path mismatch"
    assert jnp.allclose(jnp.sum(bf_out, axis=-1), 1.0, atol=1e-4), "bf16 softmax rows must sum to 1"

    print("KERNEL_OK")
</pallas_src>

<mosaic_0001>
module attributes {stable_mosaic.version = 11 : i64} {
  func.func @actor_kernel(%arg0: i32, %arg1: memref<8x32xf32, #tpu.memory_space<vmem>>, %arg2: memref<32x256xf32, #tpu.memory_space<vmem>>, %arg3: memref<1x256xf32, #tpu.memory_space<vmem>>, %arg4: memref<256x256xf32, #tpu.memory_space<vmem>>, %arg5: memref<1x256xf32, #tpu.memory_space<vmem>>, %arg6: memref<256x128xf32, #tpu.memory_space<vmem>>, %arg7: memref<1x128xf32, #tpu.memory_space<vmem>>, %arg8: memref<8x128xf32, #tpu.memory_space<vmem>>) attributes {dimension_semantics = [#tpu.dimension_semantics<parallel>], iteration_bounds = array<i64: 1>, scalar_prefetch = 0 : i64, scratch_operands = 0 : i64, tpu.core_type = #tpu.core_type<tc>, window_params = [{transform_indices = @transform_0, window_bounds = array<i64: 8, 32>}, {pipeline_mode = #tpu.pipeline_mode<synchronous>, transform_indices = @transform_1, window_bounds = array<i64: 32, 256>}, {pipeline_mode = #tpu.pipeline_mode<synchronous>, transform_indices = @transform_2, window_bounds = array<i64: 1, 256>}, {pipeline_mode = #tpu.pipeline_mode<synchronous>, transform_indices = @transform_3, window_bounds = array<i64: 256, 256>}, {pipeline_mode = #tpu.pipeline_mode<synchronous>, transform_indices = @transform_4, window_bounds = array<i64: 1, 256>}, {pipeline_mode = #tpu.pipeline_mode<synchronous>, transform_indices = @transform_5, window_bounds = array<i64: 256, 128>}, {pipeline_mode = #tpu.pipeline_mode<synchronous>, transform_indices = @transform_6, window_bounds = array<i64: 1, 128>}, {transform_indices = @transform_7, window_bounds = array<i64: 8, 128>}]} {
    %c0 = arith.constant 0 : index
    %c0_0 = arith.constant 0 : index
    %0 = vector.load %arg1[%c0, %c0_0] : memref<8x32xf32, #tpu.memory_space<vmem>>, vector<8x32xf32>
    %c0_1 = arith.constant 0 : index
    %c0_2 = arith.constant 0 : index
    %1 = vector.load %arg2[%c0_1, %c0_2] : memref<32x256xf32, #tpu.memory_space<vmem>>, vector<32x256xf32>
    %cst = arith.constant dense<0.000000e+00> : vector<8x256xf32>
    %2 = tpu.matmul %0, %1, %cst {dimension_numbers = #tpu.dot_dimension_numbers<[1], [0], [0], [1], [0, 0, 1, 1], [], []>} : vector<8x32xf32>, vector<32x256xf32>, vector<8x256xf32> -> vector<8x256xf32>
    %c0_3 = arith.constant 0 : index
    %c0_4 = arith.constant 0 : index
    %3 = vector.load %arg3[%c0_3, %c0_4] : memref<1x256xf32, #tpu.memory_space<vmem>>, vector<1x256xf32>
    %4 = vector.broadcast %3 : vector<1x256xf32> to vector<8x256xf32>
    %5 = arith.addf %2, %4 : vector<8x256xf32>
    %c0_5 = arith.constant 0 : index
    %c0_6 = arith.constant 0 : index
    %6 = vector.load %arg4[%c0_5, %c0_6] : memref<256x256xf32, #tpu.memory_space<vmem>>, vector<256x256xf32>
    %cst_7 = arith.constant dense<0.000000e+00> : vector<8x256xf32>
    %7 = tpu.matmul %5, %6, %cst_7 {dimension_numbers = #tpu.dot_dimension_numbers<[1], [0], [0], [1], [0, 0, 1, 1], [], []>} : vector<8x256xf32>, vector<256x256xf32>, vector<8x256xf32> -> vector<8x256xf32>
    %c0_8 = arith.constant 0 : index
    %c0_9 = arith.constant 0 : index
    %8 = vector.load %arg5[%c0_8, %c0_9] : memref<1x256xf32, #tpu.memory_space<vmem>>, vector<1x256xf32>
    %9 = vector.broadcast %8 : vector<1x256xf32> to vector<8x256xf32>
    %10 = arith.addf %7, %9 : vector<8x256xf32>
    %cst_10 = arith.constant 0.000000e+00 : f32
    %11 = vector.broadcast %cst_10 : f32 to vector<8x256xf32>
    %12 = arith.maximumf %10, %11 : vector<8x256xf32>
    %c0_11 = arith.constant 0 : index
    %c0_12 = arith.constant 0 : index
    %13 = vector.load %arg6[%c0_11, %c0_12] : memref<256x128xf32, #tpu.memory_space<vmem>>, vector<256x128xf32>
    %cst_13 = arith.constant dense<0.000000e+00> : vector<8x128xf32>
    %14 = tpu.matmul %12, %13, %cst_13 {dimension_numbers = #tpu.dot_dimension_numbers<[1], [0], [0], [1], [0, 0, 1, 1], [], []>} : vector<8x256xf32>, vector<256x128xf32>, vector<8x128xf32> -> vector<8x128xf32>
    %c0_14 = arith.constant 0 : index
    %c0_15 = arith.constant 0 : index
    %15 = vector.load %arg7[%c0_14, %c0_15] : memref<1x128xf32, #tpu.memory_space<vmem>>, vector<1x128xf32>
    %16 = vector.broadcast %15 : vector<1x128xf32> to vector<8x128xf32>
    %17 = arith.addf %14, %16 : vector<8x128xf32>
    %cst_16 = arith.constant dense<0xFF800000> : vector<8xf32>
    %18 = vector.multi_reduction <maximumf>, %17, %cst_16 [1] : vector<8x128xf32> to vector<8xf32>
    %19 = vector.shape_cast %18 : vector<8xf32> to vector<8x1xf32>
    %20 = vector.broadcast %19 : vector<8x1xf32> to vector<8x128xf32>
    %21 = arith.subf %17, %20 : vector<8x128xf32>
    %22 = math.exp %21 : vector<8x128xf32>
    %cst_17 = arith.constant dense<0.000000e+00> : vector<8xf32>
    %23 = vector.multi_reduction <add>, %22, %cst_17 [1] : vector<8x128xf32> to vector<8xf32>
    %24 = vector.shape_cast %23 : vector<8xf32> to vector<8x1xf32>
    %25 = tpu.reciprocal %24 {approx = true} : vector<8x1xf32> -> vector<8x1xf32>
    %26 = arith.mulf %24, %25 : vector<8x1xf32>
    %cst_18 = arith.constant 2.000000e+00 : f32
    %27 = vector.broadcast %cst_18 : f32 to vector<8x1xf32>
    %28 = arith.subf %27, %26 : vector<8x1xf32>
    %29 = arith.mulf %25, %28 : vector<8x1xf32>
    %30 = vector.broadcast %29 : vector<8x1xf32> to vector<8x128xf32>
    %31 = arith.mulf %22, %30 : vector<8x128xf32>
    %c0_19 = arith.constant 0 : index
    %c0_20 = arith.constant 0 : index
    %32 = vector.load %arg8[%c0_19, %c0_20] : memref<8x128xf32, #tpu.memory_space<vmem>>, vector<8x128xf32>
    tpu.vector_store %arg8[%c0_19, %c0_20], %31 {strides = array<i32>} : memref<8x128xf32, #tpu.memory_space<vmem>>, vector<8x128xf32>,
    return
  }
  func.func @transform_0(%arg0: i32) -> (i32, i32) {
    %c0_i32 = arith.constant 0 : i32
    %c0_i32_0 = arith.constant 0 : i32
    return %arg0, %c0_i32 : i32, i32
  }
  func.func @transform_1(%arg0: i32) -> (i32, i32) {
    %c0_i32 = arith.constant 0 : i32
    %c0_i32_0 = arith.constant 0 : i32
    %c0_i32_1 = arith.constant 0 : i32
    return %c0_i32, %c0_i32_0 : i32, i32
  }
  func.func @transform_2(%arg0: i32) -> (i32, i32) {
    %c0_i32 = arith.constant 0 : i32
    %c0_i32_0 = arith.constant 0 : i32
    %c0_i32_1 = arith.constant 0 : i32
    return %c0_i32, %c0_i32_0 : i32, i32
  }
  func.func @transform_3(%arg0: i32) -> (i32, i32) {
    %c0_i32 = arith.constant 0 : i32
    %c0_i32_0 = arith.constant 0 : i32
    %c0_i32_1 = arith.constant 0 : i32
    return %c0_i32, %c0_i32_0 : i32, i32
  }
  func.func @transform_4(%arg0: i32) -> (i32, i32) {
    %c0_i32 = arith.constant 0 : i32
    %c0_i32_0 = arith.constant 0 : i32
    %c0_i32_1 = arith.constant 0 : i32
    return %c0_i32, %c0_i32_0 : i32, i32
  }
  func.func @transform_5(%arg0: i32) -> (i32, i32) {
    %c0_i32 = arith.constant 0 : i32
    %c0_i32_0 = arith.constant 0 : i32
    %c0_i32_1 = arith.constant 0 : i32
    return %c0_i32, %c0_i32_0 : i32, i32
  }
  func.func @transform_6(%arg0: i32) -> (i32, i32) {
    %c0_i32 = arith.constant 0 : i32
    %c0_i32_0 = arith.constant 0 : i32
    %c0_i32_1 = arith.constant 0 : i32
    return %c0_i32, %c0_i32_0 : i32, i32
  }
  func.func @transform_7(%arg0: i32) -> (i32, i32) {
    %c0_i32 = arith.constant 0 : i32
    %c0_i32_0 = arith.constant 0 : i32
    return %arg0, %c0_i32 : i32, i32
  }
}

</mosaic_0001>

<bundles_post_ra>
// kernel: tpu_custom_call.1
= control target key start
LH: loop header
LB: loop body
LE: loop exit
PB: predicated region body
PF: predicated region fallthrough
CT: control target
= control target key end

     0   :  { %12 = vsyncpa [#allocation3], 0  ;;  %s862_s0 = inlined_call_operand.hbm [shape: f32[8,32], index: 0, kind: input, shape index: {}]   ;;  %s863_s1 = inlined_call_operand.hbm [shape: f32[32,256], index: 1, kind: input, shape index: {}]   ;;  %s864_s2 = inlined_call_operand.vmem [shape: f32[1,256], index: 2, kind: input, shape index: {}]   ;;  %s865_s3 = inlined_call_operand.hbm [shape: f32[256,256], index: 3, kind: input, shape index: {}]   ;;  %s866_s4 = inlined_call_operand.vmem [shape: f32[1,256], index: 4, kind: input, shape index: {}]   ;;  %s867_s5 = inlined_call_operand.hbm [shape: f32[256,128], index: 5, kind: input, shape index: {}]   ;;  %s868_s6 = inlined_call_operand.vmem [shape: f32[1,128], index: 6, kind: input, shape index: {}]   ;;  %s869_s7 = inlined_call_operand.hbm [shape: f32[8,128], index: 7, kind: output, shape index: {}]  }
   0x1   :  { %13 = vsyncpa [#allocation6], 0 }
   0x2   :  { %14 = vsyncpa [#allocation9], 0 }
   0x3   :  { %15 = vsyncpa [#allocation4], 0  ;;  %s737_s24 = smov [#allocation5]   ;;  %s619_s28 = scalar_lea.hbm %s863_s1, 1024 }
   0x4   :  { %s31_s25 = sshll.u32 %s737_s24, 4  ;;  %p620_p0 = scmp.ne.s32.totalorder %s863_s1, %s619_s28  ;;  %s32_s25 = int_to_ptr.vmem [resolvable:$true] %s31_s25 }
   0x5   :  { %p623_p1 = scmp.lt.u32.totalorder %s619_s28, %s863_s1 }
   0x7   :  { %p625_p2 = pnand %p623_p1, %p620_p0 }
   0x9   :  { %628 = shalt.err (!%p625_p2)
}
   0xa   :  { %s629_s10 = scalar_lea.vmem %s32_s25, 1024  ;;  %p634_p4 = scmp.lt.s32.totalorder %s32_s25, %s32_s25 }
   0xb   :  { %p630_p3 = scmp.ne.s32.totalorder %s32_s25, %s629_s10  ;;  %p635_p5 = scmp.lt.s32.totalorder %s629_s10, %s629_s10 }
   0xd   :  { %p636_p6 = por %p635_p5, %p634_p4 }
   0xf   :  { %p637_p7 = pnand %p636_p6, %p630_p3 }
  0x11   :  { %640 = shalt.err (!%p637_p7)
}
  0x12   :  { %s738_s11 = smov 256   ;;  %s739_s12 = smov 16  }
  0x13   :  { %37 = dma.hbm_to_vmem [thread:$0]  %s863_s1, 1024, %s32_s25, [#allocation6], %s738_s11, %s738_s11, %s739_s12  }
  0x14   :  { %s740_s15 = smov [#allocation2]   ;;  %s741_s17 = smov [#allocation7]  }
  0x15   :  { %s22_s16 = sshll.u32 %s740_s15, 4  ;;  %s45_s18 = sshll.u32 %s741_s17, 4  ;;  %s23_s16 = int_to_ptr.vmem [resolvable:$true] %s22_s16  ;;  %s46_s18 = int_to_ptr.vmem [resolvable:$true] %s45_s18 }
  0x16   :  { %s641_s21 = scalar_lea.hbm %s862_s0, 128 }
  0x17   :  { %p642_p8 = scmp.ne.s32.totalorder %s862_s0, %s641_s21  ;;  %p645_p9 = scmp.lt.u32.totalorder %s641_s21, %s862_s0 }
  0x19   :  { %p647_p10 = pnand %p645_p9, %p642_p8 }
  0x1b   :  { %650 = shalt.err (!%p647_p10)
}
  0x1c   :  { %s651_s1 = scalar_lea.vmem %s23_s16, 128  ;;  %p656_p12 = scmp.lt.s32.totalorder %s23_s16, %s23_s16 }
  0x1d   :  { %p652_p11 = scmp.ne.s32.totalorder %s23_s16, %s651_s1  ;;  %p657_p13 = scmp.lt.s32.totalorder %s651_s1, %s651_s1 }
  0x1f   :  { %p658_p0 = por %p657_p13, %p656_p12 }
  0x21   :  { %p659_p1 = pnand %p658_p0, %p652_p11 }
  0x23   :  { %662 = shalt.err (!%p659_p1)
}
  0x24   :  { %25 = dma.hbm_to_vmem [thread:$0]  %s862_s0, 128, %s23_s16, [#allocation3]  }
  0x25   :  { %s663_s30 = scalar_lea.hbm %s865_s3, 8192 }
  0x26   :  { %p664_p2 = scmp.ne.s32.totalorder %s865_s3, %s663_s30  ;;  %p667_p3 = scmp.lt.u32.totalorder %s663_s30, %s865_s3 }
  0x28   :  { %p669_p4 = pnand %p667_p3, %p664_p2 }
  0x2a   :  { %672 = shalt.err (!%p669_p4)
}
  0x2b   :  { %s673_s14 = scalar_lea.vmem %s46_s18, 8192  ;;  %p678_p6 = scmp.lt.s32.totalorder %s46_s18, %s46_s18 }
  0x2c   :  { %p674_p5 = scmp.ne.s32.totalorder %s46_s18, %s673_s14  ;;  %p679_p7 = scmp.lt.s32.totalorder %s673_s14, %s673_s14 }
  0x2e   :  { %p680_p8 = por %p679_p7, %p678_p6 }
  0x30   :  { %p681_p9 = pnand %p680_p8, %p674_p5 }
  0x32   :  { %684 = shalt.err (!%p681_p9)
}
  0x33   :  { %51 = dma.hbm_to_vmem [thread:$0]  %s865_s3, 8192, %s46_s18, [#allocation6], %s738_s11, %s738_s11, %s739_s12  }
  0x34   :  { %s742_s16 = smov [#allocation8]   ;;  %s685_s21 = scalar_lea.hbm %s867_s5, 4096 }
  0x35   :  { %s59_s17 = sshll.u32 %s742_s16, 4  ;;  %p686_p10 = scmp.ne.s32.totalorder %s867_s5, %s685_s21  ;;  %s60_s17 = int_to_ptr.vmem [resolvable:$true] %s59_s17 }
  0x36   :  { %p689_p11 = scmp.lt.u32.totalorder %s685_s21, %s867_s5 }
  0x38   :  { %p691_p12 = pnand %p689_p11, %p686_p10 }
  0x3a   :  { %694 = shalt.err (!%p691_p12)
}
  0x3b   :  { %s695_s1 = scalar_lea.vmem %s60_s17, 4096  ;;  %p700_p0 = scmp.lt.s32.totalorder %s60_s17, %s60_s17 }
  0x3c   :  { %p696_p13 = scmp.ne.s32.totalorder %s60_s17, %s695_s1  ;;  %p701_p1 = scmp.lt.s32.totalorder %s695_s1, %s695_s1 }
  0x3e   :  { %p702_p2 = por %p701_p1, %p700_p0 }
  0x40   :  { %p703_p3 = pnand %p702_p2, %p696_p13 }
  0x42   :  { %706 = shalt.err (!%p703_p3)
}
  0x43   :  { %s743_s3 = smov 128   ;;  %s744_s11 = smov 8  }
  0x44   :  { %65 = dma.hbm_to_vmem [thread:$0]  %s867_s5, 4096, %s60_s17, [#allocation9], %s743_s3, %s743_s3, %s744_s11  }
  0x45   :  { %729 = dma.done.wait [#allocation3], 128  }
  0x46   :  { %730 = vsyncadd [#allocation3], 4294967168 }
  0x47   :  { %731 = dma.done.wait [#allocation6], 9216  }
  0x48   :  { %732 = vsyncadd [#allocation6], 4294958080 }
  0x49   :  { %733 = dma.done.wait [#allocation9], 4096  }
  0x4a   :  { %734 = vsyncadd [#allocation9], 4294963200  ;;  %v745_v0 = vmov 0.0   ;;  %v82_v1 = vld [vmem:[#allocation5 + $0x8] sm:$0xff]  ;;  %v84_v2 = vld [vmem:[#allocation5 + $0x18] sm:$0xff]  ;;  %vm101_vm0 = vcmask 261120  }
  0x4b   :  { %169 = vmatprep.mubr.f32.mxu0 %v745_v0  ;;  %v81_v3 = vld [vmem:[#allocation5] sm:$0xff]  ;;  %v501_v4 = vpack.c.bf16 %v84_v2, %v82_v1  ;;  %v83_v5 = vld [vmem:[#allocation5 + $0x10] sm:$0xff]  ;;  %v86_v6 = vld [vmem:[#allocation5 + $0x28] sm:$0xff] }
  0x4c   :  { %v88_v7 = vld [vmem:[#allocation5 + $0x38] sm:$0xff]  ;;  %v503_v8 = vpack.c.bf16 %v83_v5, %v81_v3  ;;  %v85_v10 = vld [vmem:[#allocation5 + $0x20] sm:$0xff]  ;;  %v87_v11 = vld [vmem:[#allocation5 + $0x30] sm:$0xff] }
  0x4d   :  { %v505_v9 = vpack.c.bf16 %v88_v7, %v86_v6  ;;  %502 = vmatprep.subr.bf16.mxu0 %v501_v4  ;;  %v177_v12 = vld [vmem:[#allocation7 + $0x8] sm:$0xff]  ;;  %v179_v13 = vld [vmem:[#allocation7 + $0x18] sm:$0xff]  ;;  %v176_v14 = vld [vmem:[#allocation7] sm:$0xff]  ;;  %v507_v15 = vpack.c.bf16 %v87_v11, %v85_v10 }
  0x4e   :  { %504 = vmatpush1.bf16.msra.mxu0 %v503_v8  ;;  %v509_v16 = vpack.c.bf16 %v179_v13, %v177_v12  ;;  %v178_v17 = vld [vmem:[#allocation7 + $0x10] sm:$0xff]  ;;  %v181_v18 = vld [vmem:[#allocation7 + $0x28] sm:$0xff]  ;;  %v183_v19 = vld [vmem:[#allocation7 + $0x38] sm:$0xff] }
  0x4f   :  { %506 = vmatprep.subr.bf16.mxu0 %v505_v9  ;;  %v511_v20 = vpack.c.bf16 %v178_v17, %v176_v14  ;;  %v513_v21 = vpack.c.bf16 %v183_v19, %v181_v18  ;;  %v180_v22 = vld [vmem:[#allocation7 + $0x20] sm:$0xff]  ;;  %v182_v23 = vld [vmem:[#allocation7 + $0x30] sm:$0xff]  ;;  %v185_v24 = vld [vmem:[#allocation7 + $0x48] sm:$0xff] }
  0x50   :  { %510 = vmatprep.subr.bf16.mxu1 %v509_v16  ;;  %v187_v25 = vld [vmem:[#allocation7 + $0x58] sm:$0xff]  ;;  %v515_v26 = vpack.c.bf16 %v182_v23, %v180_v22  ;;  %v184_v29 = vld [vmem:[#allocation7 + $0x40] sm:$0xff]  ;;  %v186_v30 = vld [vmem:[#allocation7 + $0x50] sm:$0xff] }
  0x51   :  { %512 = vmatpush1.bf16.msra.mxu1 %v511_v20  ;;  %v80_v27 = vld [vmem:[#allocation2] sm:$0xff]  ;;  %v517_v28 = vpack.c.bf16 %v187_v25, %v185_v24  ;;  %v189_v31 = vld [vmem:[#allocation7 + $0x68] sm:$0xff]  ;;  %v519_v33 = vpack.c.bf16 %v186_v30, %v184_v29  ;;  %v188_v35 = vld [vmem:[#allocation7 + $0x60] sm:$0xff] }
  0x52   :  { %508 = vmatpush1.bf16.msra.mxu0 %v507_v15  ;;  %514 = vmatprep.subr.bf16.mxu1 %v513_v21  ;;  %v191_v32 = vld [vmem:[#allocation7 + $0x78] sm:$0xff]  ;;  %v190_v36 = vld [vmem:[#allocation7 + $0x70] sm:$0xff]  ;;  %v193_v37 = vld [vmem:[#allocation7 + $0x88] sm:$0xff] }
  0x53   :  { %v521_v34 = vpack.c.bf16 %v191_v32, %v189_v31  ;;  %v195_v38 = vld [vmem:[#allocation7 + $0x98] sm:$0xff]  ;;  %v523_v39 = vpack.c.bf16 %v190_v36, %v188_v35  ;;  %v192_v41 = vld [vmem:[#allocation7 + $0x80] sm:$0xff]  ;;  %v194_v42 = vld [vmem:[#allocation7 + $0x90] sm:$0xff] }
  0x54   :  { %v525_v40 = vpack.c.bf16 %v195_v38, %v193_v37  ;;  %v197_v43 = vld [vmem:[#allocation7 + $0xa8] sm:$0xff]  ;;  %v199_v44 = vld [vmem:[#allocation7 + $0xb8] sm:$0xff]  ;;  %v527_v45 = vpack.c.bf16 %v194_v42, %v192_v41  ;;  %v196_v47 = vld [vmem:[#allocation7 + $0xa0] sm:$0xff] }
  0x55   :  { %464 = vmatmul.mubr.msk.f32.vlgmr.msra.gmra.mrb[0].mxu0 %vm101_vm0, %v80_v27  ;;  %516 = vmatpush1.bf16.msra.mxu1 %v515_v26  ;;  %v529_v46 = vpack.c.bf16 %v199_v44, %v197_v43  ;;  %v198_v48 = vld [vmem:[#allocation7 + $0xb0] sm:$0xff]  ;;  %v201_v49 = vld [vmem:[#allocation7 + $0xc8] sm:$0xff]  ;;  %v203_v50 = vld [vmem:[#allocation7 + $0xd8] sm:$0xff] }
  0x56   :  { %518 = vmatprep.subr.bf16.mxu1 %v517_v28  ;;  %v531_v51 = vpack.c.bf16 %v198_v48, %v196_v47  ;;  %v533_v52 = vpack.c.bf16 %v203_v50, %v201_v49  ;;  %v200_v53 = vld [vmem:[#allocation7 + $0xc0] sm:$0xff]  ;;  %v202_v54 = vld [vmem:[#allocation7 + $0xd0] sm:$0xff]  ;;  %v205_v55 = vld [vmem:[#allocation7 + $0xe8] sm:$0xff] }
  0x57   :  { %v207_v56 = vld [vmem:[#allocation7 + $0xf8] sm:$0xff]  ;;  %v535_v57 = vpack.c.bf16 %v202_v54, %v200_v53  ;;  %v204_v59 = vld [vmem:[#allocation7 + $0xe0] sm:$0xff]  ;;  %v206_v60 = vld [vmem:[#allocation7 + $0xf0] sm:$0xff] }
  0x58   :  { %v537_v58 = vpack.c.bf16 %v207_v56, %v205_v55  ;;  %v209_v61 = vld [vmem:[#allocation7 + $0x108] sm:$0xff]  ;;  %v211_v62 = vld [vmem:[#allocation7 + $0x118] sm:$0xff]  ;;  %v539_v63 = vpack.c.bf16 %v206_v60, %v204_v59  ;;  %v208_v1 = vld [vmem:[#allocation7 + $0x100] sm:$0xff] }
  0x59   :  { %520 = vmatpush1.bf16.msra.mxu1 %v519_v33  ;;  %v541_v0 = vpack.c.bf16 %v211_v62, %v209_v61  ;;  %v210_v2 = vld [vmem:[#allocation7 + $0x110] sm:$0xff]  ;;  %v213_v3 = vld [vmem:[#allocation7 + $0x128] sm:$0xff]  ;;  %v215_v4 = vld [vmem:[#allocation7 + $0x138] sm:$0xff] }
  0x5a   :  { %522 = vmatprep.subr.bf16.mxu1 %v521_v34  ;;  %v543_v5 = vpack.c.bf16 %v210_v2, %v208_v1  ;;  %v545_v6 = vpack.c.bf16 %v215_v4, %v213_v3  ;;  %v212_v7 = vld [vmem:[#allocation7 + $0x120] sm:$0xff]  ;;  %v214_v8 = vld [vmem:[#allocation7 + $0x130] sm:$0xff]  ;;  %v217_v9 = vld [vmem:[#allocation7 + $0x148] sm:$0xff] }
  0x5b   :  { %v219_v10 = vld [vmem:[#allocation7 + $0x158] sm:$0xff]  ;;  %v547_v11 = vpack.c.bf16 %v214_v8, %v212_v7  ;;  %v216_v13 = vld [vmem:[#allocation7 + $0x140] sm:$0xff]  ;;  %v218_v14 = vld [vmem:[#allocation7 + $0x150] sm:$0xff] }
  0x5c   :  { %v549_v12 = vpack.c.bf16 %v219_v10, %v217_v9  ;;  %v221_v15 = vld [vmem:[#allocation7 + $0x168] sm:$0xff]  ;;  %v223_v16 = vld [vmem:[#allocation7 + $0x178] sm:$0xff]  ;;  %v551_v17 = vpack.c.bf16 %v218_v14, %v216_v13  ;;  %v220_v19 = vld [vmem:[#allocation7 + $0x160] sm:$0xff] }
  0x5d   :  { %524 = vmatpush1.bf16.msra.mxu1 %v523_v39  ;;  %v553_v18 = vpack.c.bf16 %v223_v16, %v221_v15  ;;  %v222_v20 = vld [vmem:[#allocation7 + $0x170] sm:$0xff]  ;;  %v225_v21 = vld [vmem:[#allocation7 + $0x188] sm:$0xff]  ;;  %v227_v22 = vld [vmem:[#allocation7 + $0x198] sm:$0xff] }
  0x5e   :  { %526 = vmatprep.subr.bf16.mxu1 %v525_v40  ;;  %v555_v23 = vpack.c.bf16 %v222_v20, %v220_v19  ;;  %v557_v24 = vpack.c.bf16 %v227_v22, %v225_v21  ;;  %v224_v25 = vld [vmem:[#allocation7 + $0x180] sm:$0xff]  ;;  %v226_v26 = vld [vmem:[#allocation7 + $0x190] sm:$0xff]  ;;  %v229_v27 = vld [vmem:[#allocation7 + $0x1a8] sm:$0xff]  ;;  %v91_v21 = vlaneseq }
  0x5f   :  { %v231_v28 = vld [vmem:[#allocation7 + $0x1b8] sm:$0xff]  ;;  %v559_v29 = vpack.c.bf16 %v226_v26, %v224_v25  ;;  %v228_v31 = vld [vmem:[#allocation7 + $0x1a0] sm:$0xff]  ;;  %v230_v32 = vld [vmem:[#allocation7 + $0x1b0] sm:$0xff] }
  0x60   :  { %v561_v30 = vpack.c.bf16 %v231_v28, %v229_v27  ;;  %v233_v33 = vld [vmem:[#allocation7 + $0x1c8] sm:$0xff]  ;;  %v235_v34 = vld [vmem:[#allocation7 + $0x1d8] sm:$0xff]  ;;  %v563_v35 = vpack.c.bf16 %v230_v32, %v228_v31  ;;  %v232_v37 = vld [vmem:[#allocation7 + $0x1c0] sm:$0xff]  ;;  %v92_v22 = vshrl.u32 %v91_v21, 7 }
  0x61   :  { %528 = vmatpush1.bf16.msra.mxu1 %v527_v45  ;;  %v565_v36 = vpack.c.bf16 %v235_v34, %v233_v33  ;;  %v234_v38 = vld [vmem:[#allocation7 + $0x1d0] sm:$0xff]  ;;  %v237_v40 = vld [vmem:[#allocation7 + $0x1e8] sm:$0xff]  ;;  %v239_v41 = vld [vmem:[#allocation7 + $0x1f8] sm:$0xff] }
  0x62   :  { %530 = vmatprep.subr.bf16.mxu1 %v529_v46  ;;  %v567_v39 = vpack.c.bf16 %v234_v38, %v232_v37  ;;  %v569_v42 = vpack.c.bf16 %v239_v41, %v237_v40  ;;  %v236_v43 = vld [vmem:[#allocation7 + $0x1e0] sm:$0xff]  ;;  %v238_v44 = vld [vmem:[#allocation7 + $0x1f0] sm:$0xff]  ;;  %v342_v47 = vld [vmem:[#allocation8 + $0x88] sm:$0xff]  ;;  %v93_v25 = vsub.s32 0, %v92_v22 }
  0x63   :  { %v571_v45 = vpack.c.bf16 %v238_v44, %v236_v43  ;;  %v341_v46 = vld [vmem:[#allocation8 + $0x80] sm:$0xff]  ;;  %v326_v50 = vld [vmem:[#allocation8 + $0x8] sm:$0xff]  ;;  %v327_v55 = vld [vmem:[#allocation8 + $0x10] sm:$0xff] }
  0x64   :  { %v325_v48 = vld [vmem:[#allocation8] sm:$0xff]  ;;  %v573_v49 = vpack.c.bf16 %v342_v47, %v341_v46  ;;  %v328_v56 = vld [vmem:[#allocation8 + $0x18] sm:$0xff]  ;;  %v330_v62 = vld [vmem:[#allocation8 + $0x28] sm:$0xff] }
  0x65   :  { %532 = vmatpush1.bf16.msra.mxu1 %v531_v51  ;;  %v343_v51 = vld [vmem:[#allocation8 + $0x90] sm:$0xff]  ;;  %v575_v53 = vpack.c.bf16 %v326_v50, %v325_v48  ;;  %v579_v59 = vpack.c.bf16 %v328_v56, %v327_v55  ;;  %v329_v61 = vld [vmem:[#allocation8 + $0x20] sm:$0xff]  ;;  %v332_v4 = vld [vmem:[#allocation8 + $0x38] sm:$0xff] }
  0x66   :  { %534 = vmatprep.subr.bf16.mxu1 %v533_v52  ;;  %v344_v52 = vld [vmem:[#allocation8 + $0x98] sm:$0xff]  ;;  %574 = vmatprep.subr.bf16.mxu0 %v573_v49  ;;  %v583_v1 = vpack.c.bf16 %v330_v62, %v329_v61  ;;  %v331_v3 = vld [vmem:[#allocation8 + $0x30] sm:$0xff]  ;;  %v333_v9 = vld [vmem:[#allocation8 + $0x40] sm:$0xff] }
  0x67   :  { %v577_v54 = vpack.c.bf16 %v344_v52, %v343_v51  ;;  %576 = vmatpush3.bf16.msra.mxu0 %v575_v53  ;;  %v587_v7 = vpack.c.bf16 %v332_v4, %v331_v3  ;;  %v334_v10 = vld [vmem:[#allocation8 + $0x48] sm:$0xff]  ;;  %v335_v15 = vld [vmem:[#allocation8 + $0x50] sm:$0xff]  ;;  %v336_v16 = vld [vmem:[#allocation8 + $0x58] sm:$0xff] }
  0x68   :  { %v591_v13 = vpack.c.bf16 %v334_v10, %v333_v9  ;;  %v595_v19 = vpack.c.bf16 %v336_v16, %v335_v15  ;;  %v337_v32 = vld [vmem:[#allocation8 + $0x60] sm:$0xff]  ;;  %v338_v33 = vld [vmem:[#allocation8 + $0x68] sm:$0xff]  ;;  %v339_v38 = vld [vmem:[#allocation8 + $0x70] sm:$0xff] }
  0x69   :  { %536 = vmatpush1.bf16.msra.mxu1 %v535_v57  ;;  %v345_v57 = vld [vmem:[#allocation8 + $0xa0] sm:$0xff]  ;;  %578 = vmatprep.subr.bf16.mxu0 %v577_v54  ;;  %v599_v34 = vpack.c.bf16 %v338_v33, %v337_v32  ;;  %v240_v41 = vld [vmem:[%s866_s4] sm:$0x3]  ;;  %s746_s4 = smov [#allocation10]  }
  0x6a   :  { %538 = vmatprep.subr.bf16.mxu1 %v537_v58  ;;  %v346_v58 = vld [vmem:[#allocation8 + $0xa8] sm:$0xff]  ;;  %v465_v52 = vld [vmem:[%s868_s6] ss:$0 sm:$0xff]  ;;  %s453_s30 = sshll.u32 %s746_s4, 4  ;;  %s454_s30 = int_to_ptr.vmem [resolvable:$true] %s453_s30 }
  0x6b   :  { %v581_v60 = vpack.c.bf16 %v346_v58, %v345_v57  ;;  %580 = vmatpush3.bf16.msra.mxu0 %v579_v59  ;;  %s707_s6 = scalar_lea.vmem %s454_s30, 128  ;;  %p712_p5 = scmp.lt.s32.totalorder %s454_s30, %s454_s30 }
  0x6c   :  { %p708_p4 = scmp.ne.s32.totalorder %s454_s30, %s707_s6  ;;  %p713_p6 = scmp.lt.s32.totalorder %s707_s6, %s707_s6 }
  0x6d   :  { %540 = vmatpush1.bf16.msra.mxu1 %v539_v63  ;;  %v347_v63 = vld [vmem:[#allocation8 + $0xb0] sm:$0xff]  ;;  %582 = vmatprep.subr.bf16.mxu0 %v581_v60 }
  0x6e   :  { %542 = vmatprep.subr.bf16.mxu1 %v541_v0  ;;  %v348_v0 = vld [vmem:[#allocation8 + $0xb8] sm:$0xff]  ;;  %p714_p7 = por %p713_p6, %p712_p5 }
  0x6f   :  { %v585_v2 = vpack.c.bf16 %v348_v0, %v347_v63  ;;  %584 = vmatpush3.bf16.msra.mxu0 %v583_v1 }
  0x70   :  { %p715_p8 = pnand %p714_p7, %p708_p4 }
  0x71   :  { %544 = vmatpush1.bf16.msra.mxu1 %v543_v5  ;;  %v349_v5 = vld [vmem:[#allocation8 + $0xc0] sm:$0xff]  ;;  %586 = vmatprep.subr.bf16.mxu0 %v585_v2 }
  0x72   :  { %546 = vmatprep.subr.bf16.mxu1 %v545_v6  ;;  %v350_v6 = vld [vmem:[#allocation8 + $0xc8] sm:$0xff] }
  0x73   :  { %v589_v8 = vpack.c.bf16 %v350_v6, %v349_v5  ;;  %588 = vmatpush3.bf16.msra.mxu0 %v587_v7 }
  0x75   :  { %548 = vmatpush1.bf16.msra.mxu1 %v547_v11  ;;  %v351_v11 = vld [vmem:[#allocation8 + $0xd0] sm:$0xff]  ;;  %590 = vmatprep.subr.bf16.mxu0 %v589_v8 }
  0x76   :  { %550 = vmatprep.subr.bf16.mxu1 %v549_v12  ;;  %v352_v12 = vld [vmem:[#allocation8 + $0xd8] sm:$0xff] }
  0x77   :  { %v593_v14 = vpack.c.bf16 %v352_v12, %v351_v11  ;;  %592 = vmatpush3.bf16.msra.mxu0 %v591_v13 }
  0x79   :  { %552 = vmatpush1.bf16.msra.mxu1 %v551_v17  ;;  %v353_v17 = vld [vmem:[#allocation8 + $0xe0] sm:$0xff]  ;;  %594 = vmatprep.subr.bf16.mxu0 %v593_v14 }
  0x7a   :  { %554 = vmatprep.subr.bf16.mxu1 %v553_v18  ;;  %v354_v18 = vld [vmem:[#allocation8 + $0xe8] sm:$0xff] }
  0x7b   :  { %v597_v20 = vpack.c.bf16 %v354_v18, %v353_v17  ;;  %596 = vmatpush3.bf16.msra.mxu0 %v595_v19 }
  0x7d   :  { %556 = vmatpush1.bf16.msra.mxu1 %v555_v23  ;;  %598 = vmatprep.subr.bf16.mxu0 %v597_v20  ;;  %v97_v23 = vsub.s32 1, %v92_v22 }
  0x7e   :  { %558 = vmatprep.subr.bf16.mxu1 %v557_v24  ;;  %v89_v24 = vld [vmem:[%s864_s2] sm:$0x3] }
  0x7f   :  { %v98_v26 = vrot.slane %v89_v24, %v97_v23  ;;  %v94_v27 = vrot.slane %v89_v24, %v93_v25  ;;  %600 = vmatpush3.bf16.msra.mxu0 %v599_v34  ;;  %v249_v43 = vrot.slane %v240_v41, %v97_v23 }
  0x81   :  { %560 = vmatpush1.bf16.msra.mxu1 %v559_v29 }
  0x82   :  { %562 = vmatprep.subr.bf16.mxu1 %v561_v30 }
  0x85   :  { %564 = vmatpush1.bf16.msra.mxu1 %v563_v35  ;;  %v355_v35 = vld [vmem:[#allocation8 + $0xf0] sm:$0xff] }
  0x86   :  { %566 = vmatprep.subr.bf16.mxu1 %v565_v36  ;;  %v356_v36 = vld [vmem:[#allocation8 + $0xf8] sm:$0xff] }
  0x87   :  { %v601_v37 = vpack.c.bf16 %v356_v36, %v355_v35 }
  0x89   :  { %568 = vmatpush1.bf16.msra.mxu1 %v567_v39  ;;  %v340_v39 = vld [vmem:[#allocation8 + $0x78] sm:$0xff]  ;;  %602 = vmatprep.subr.bf16.mxu0 %v601_v37 }
  0x8a   :  { %570 = vmatprep.subr.bf16.mxu1 %v569_v42  ;;  %v603_v40 = vpack.c.bf16 %v340_v39, %v339_v38  ;;  %v245_v42 = vrot.slane %v240_v41, %v93_v25 }
  0x8c   :  { %604 = vmatpush3.bf16.msra.mxu0 %v603_v40 }
  0x8d   :  { %572 = vmatpush1.bf16.msra.mxu1 %v571_v45 }
 0x128   :  { %v171_v28 = vpop.f32.mrb[0].mxu0 }
 0x129   :  { %v173_v29 = vpop.f32.mrb[1].mxu0  ;;  %v172_v31 = vadd.f32 %v171_v28, %v94_v27 }
 0x12a   :  { %v174_v30 = vadd.f32 %v173_v29, %v98_v26 }
 0x12c   :  { %316 = vmatprep.mubr.f32.mxu1 %v174_v30 }
 0x12d   :  { %317 = vmatmul.mubr.f32.vlgmr.msra.gmra.mrb[0].mxu1 %v172_v31 }
 0x200   :  { %v318_v44 = vpop.f32.mrb[0].mxu1 }
 0x201   :  { %v319_v45 = vadd.f32 %v318_v44, %v245_v42  ;;  %v320_v46 = vpop.f32.mrb[1].mxu1 }
 0x202   :  { %v321_v47 = vadd.f32 %v320_v46, %v249_v43 }
 0x203   :  { %v323_v49 = vmax.f32 %v319_v45, 0.0 }
 0x204   :  { %v324_v48 = vmax.f32 %v321_v47, 0.0 }
 0x206   :  { %428 = vmatprep.mubr.f32.mxu0 %v324_v48 }
 0x207   :  { %429 = vmatmul.mubr.f32.vlgmr.msra.gmra.mrb[2].mxu0 %v323_v49 }
 0x2da   :  { %v498_v50 = vpop.f32.mrb[2].mxu0 }
 0x2db   :  { %v499_v51 = vpop.f32.mrb[3].mxu0 }
 0x2dc   :  { %v500_v53 = vadd.f32 %v499_v51, %v498_v50 }
 0x2de   :  { %v431_v54 = vadd.f32 %v500_v53, %v465_v52 }
 0x2e0   :  { %434 = vmax.xlane.f32.xlu0 %v431_v54 }
 0x36d   :  { %v435_v55 = vpop.xlane.xlu0 %434 }
 0x36e   :  { %v436_v56 = vsub.f32 %v431_v54, %v435_v55 }
 0x370   :  { %v437_v57 = vmul.f32 1.442695, %v436_v56 }
 0x372   :  { %615 = vpow2.f32 %v437_v57 }
 0x37c   :  { %v616_v58 = vpop.eup %615 }
 0x37d   :  { %439 = vadd.xlane.f32.xlu0 %v616_v58 }
 0x40a   :  { %v440_v59 = vpop.xlane.xlu0 %439 }
 0x40b   :  { %617 = vrcp.f32 %v440_v59 }
 0x415   :  { %v618_v60 = vpop.eup %617 }
 0x416   :  { %v442_v61 = vmul.f32 %v618_v60, %v440_v59 }
 0x418   :  { %v443_v62 = vsub.f32 2.0, %v442_v61 }
 0x41a   :  { %v444_v63 = vmul.f32 %v618_v60, %v443_v62 }
 0x41c   :  { %v445_v0 = vmul.f32 %v616_v58, %v444_v63 }
 0x41e   :  { %446 = vst [vmem:[#allocation10] sm:$0xff] %v445_v0 }
 0x41f   :  { %718 = shalt.err (!%p715_p8)
}
 0x420   :  { %s719_s10 = scalar_lea.hbm %s869_s7, 128 }
 0x421   :  { %p720_p9 = scmp.ne.s32.totalorder %s869_s7, %s719_s10  ;;  %p723_p10 = scmp.lt.u32.totalorder %s719_s10, %s869_s7 }
 0x423   :  { %p725_p11 = pnand %p723_p10, %p720_p9 }
 0x425   :  { %728 = shalt.err (!%p725_p11)
}
 0x426   :  { %456 = dma.vmem_to_hbm [thread:$0]  %s454_s30, 128, %s869_s7, [#allocation4]  }
 0x427   :  { %735 = dma.done.wait [#allocation4], 128  }
 0x428   :  { %736 = vsyncadd [#allocation4], 4294967168 }
 0x429   :  { %460 = vsyncpa [#allocation3], 1 }
 0x42a   :  { %461 = vsyncpa [#allocation6], 1 }
 0x42b   :  { %462 = vsyncpa [#allocation9], 1 }
 0x42c   :  { %463 = vsyncpa [#allocation4], 1 }

</bundles_post_ra>
